<compile_context>
chip_gen: v7x
topology: tpu7x:2x2x1
jax: 0.10.0
libtpu: 0.0.40
codegen_flags: <defaults>
</compile_context>

<pallas_src>
import math

import jax
import jax.numpy as jnp
from jax.experimental import pallas as pl
from jax.experimental.pallas import tpu as pltpu


# ------------------------------- Pallas kernel ------------------------------

def _transition_kernel(x_ref, s_ref, b_ref, w_ref, p_ref, o_ref):
    # x_ref: (1, Cin, TS)   TS raw pixels (TR pooled rows worth), lane-dense
    # s_ref: (Cin, 1)       folded BatchNorm scale
    # b_ref: (Cin, 1)       folded BatchNorm bias
    # w_ref: (Cout, Cin)    1x1 conv weight
    # p_ref: (TS, TS4)      constant 2x2 avg-pool matrix (entries 0 / 0.25)
    # o_ref: (1, Cout, TS4) pooled output tile (channels-first)
    x = x_ref[0]                                               # (Cin, TS)
    a = jnp.maximum(x * s_ref[...] + b_ref[...], 0.0)          # BN + ReLU (VPU)
    y = jnp.dot(w_ref[...], a,                                 # 1x1 conv (MXU)
                preferred_element_type=jnp.float32)            # (Cout, TS)
    o_ref[0] = jnp.dot(y, p_ref[...],                          # 2x2 avg pool (MXU)
                       preferred_element_type=jnp.float32).astype(o_ref.dtype)


# --------------------------------- helpers -----------------------------------

def _pool_matrix(ts, w2):
    """(TS, TS/4) matrix mapping raw row-major pixels of a tile of TR pooled
    rows (2*TR raw rows x 2*w2 raw cols) to their pooled pixel, scaled by 0.25."""
    ts4 = ts // 4
    p = jnp.arange(ts)
    raw_row = p // (2 * w2)
    raw_col = p % (2 * w2)
    q = (raw_row // 2) * w2 + (raw_col // 2)
    return (q[:, None] == jnp.arange(ts4)[None, :]).astype(jnp.float32) * 0.25


def _pick_rows_per_tile(h2, w2, cin):
    """Pooled rows per spatial tile.

    tr == h2 (whole image) is always legal (block dims == full array dims).
    A proper divisor tr is legal only when the pooled lane extent tr*w2 is a
    multiple of 128 (Mosaic (8,128) block rule; the raw extent 4*tr*w2 then is
    too).  Prefer the largest legal tile whose x block stays <= ~1 MiB and
    whose pool matrix stays <= ~2 MiB (VMEM-friendly on v7x, pipeline depth
    on larger images)."""
    legal = [h2] + [d for d in range(1, h2)
                    if h2 % d == 0 and (d * w2) % 128 == 0]
    fits = [d for d in legal
            if cin * (4 * d * w2) * 4 <= (1 << 20)
            and (4 * d * w2) * (d * w2) * 4 <= (2 << 20)]
    return max(fits) if fits else min(legal)


# --------------------------------- wrapper ------------------------------------

def transition_block(x_nchw, bn_scale, bn_bias, conv_w):
    """x_nchw: (B, Cin, H, W) f32; conv_w: (Cout, Cin); returns (B, Cout, H//2, W//2)."""
    B, Cin, H, W = x_nchw.shape
    Cout = conv_w.shape[0]
    H2, W2 = H // 2, W // 2
    N4 = H2 * W2

    # F.avg_pool2d(·, 2) floor semantics: drop trailing odd row/col (no-op for
    # even H/W).  The reshape below is free: channels-first layout is preserved.
    x = x_nchw[:, :, : 2 * H2, : 2 * W2]
    x3 = x.reshape(B, Cin, 4 * N4)

    TR = _pick_rows_per_tile(H2, W2, Cin)
    TS4 = TR * W2              # pooled pixels per tile (output lane extent)
    TS = 4 * TS4               # raw pixels per tile (input lane extent)
    grid = (B, H2 // TR)

    P = _pool_matrix(TS, W2)   # constant; 0.25 pool factor folded in

    out = pl.pallas_call(
        _transition_kernel,
        out_shape=jax.ShapeDtypeStruct((B, Cout, N4), x_nchw.dtype),
        grid=grid,
        in_specs=[
            pl.BlockSpec((1, Cin, TS), lambda b, t: (b, 0, t)),
            pl.BlockSpec((Cin, 1), lambda b, t: (0, 0)),      # VMEM-resident
            pl.BlockSpec((Cin, 1), lambda b, t: (0, 0)),      # VMEM-resident
            pl.BlockSpec((Cout, Cin), lambda b, t: (0, 0)),   # VMEM-resident
            pl.BlockSpec((TS, TS4), lambda b, t: (0, 0)),     # VMEM-resident
        ],
        out_specs=pl.BlockSpec((1, Cout, TS4), lambda b, t: (b, 0, t)),
        compiler_params=pltpu.CompilerParams(
            dimension_semantics=("parallel", "parallel")),
    )(x3, bn_scale, bn_bias, conv_w, P)

    # Free reshape (no transpose) back to PyTorch's NCHW output layout.
    return out.reshape(B, Cout, H2, W2)


# ----------------------------- params / reference ----------------------------

def _bn_fold(c, gamma=None, beta=None, mean=None, var=None, eps=1e-5):
    gamma = jnp.ones((c,), jnp.float32) if gamma is None else gamma
    beta = jnp.zeros((c,), jnp.float32) if beta is None else beta
    mean = jnp.zeros((c,), jnp.float32) if mean is None else mean
    var = jnp.ones((c,), jnp.float32) if var is None else var
    scale = gamma / jnp.sqrt(var + eps)
    bias = beta - mean * scale
    return scale.reshape(c, 1), bias.reshape(c, 1)


def init_transition_block(key, in_planes, out_planes):
    # Conv weight stored as (Cout, Cin); a PyTorch (Cout, Cin, 1, 1) weight maps
    # via w_pt[:, :, 0, 0].  Init matches the DenseNet N(0, sqrt(2/n)) scheme.
    k_w, k_g, k_b, k_m, k_v = jax.random.split(key, 5)
    std = math.sqrt(2.0 / (1 * 1 * out_planes))
    w = std * jax.random.normal(k_w, (out_planes, in_planes), jnp.float32)
    gamma = 1.0 + 0.2 * jax.random.normal(k_g, (in_planes,), jnp.float32)
    beta = 0.1 * jax.random.normal(k_b, (in_planes,), jnp.float32)
    mean = 0.1 * jax.random.normal(k_m, (in_planes,), jnp.float32)
    var = jax.random.uniform(k_v, (in_planes,), jnp.float32, 0.5, 1.5)
    s, b = _bn_fold(in_planes, gamma, beta, mean, var)
    return {"bn_scale": s, "bn_bias": b, "conv_w": w}


def transition_block_forward(params, x_nchw):
    return transition_block(x_nchw.astype(jnp.float32),
                            params["bn_scale"], params["bn_bias"],
                            params["conv_w"])


def _reference(params, x_nchw):
    # Pure-JAX reference: bn -> relu -> conv1x1 -> avg_pool2d(2).
    C = x_nchw.shape[1]
    s = params["bn_scale"].reshape(1, C, 1, 1)
    b = params["bn_bias"].reshape(1, C, 1, 1)
    a = jnp.maximum(x_nchw * s + b, 0.0)
    y = jnp.einsum("bchw,oc->bohw", a, params["conv_w"],
                   precision=jax.lax.Precision.HIGHEST)
    B, Co, H, W = y.shape
    H2, W2 = H // 2, W // 2
    y = y[:, :, : 2 * H2, : 2 * W2]
    return y.reshape(B, Co, H2, 2, W2, 2).mean(axis=(3, 5))


# ------------------------------------ main ------------------------------------

if __name__ == "__main__":
    key = jax.random.PRNGKey(0)
    k_x, k_w = jax.random.split(key)

    B, Cin, H, W = 2, 48, 16, 16
    Cout = 24                       # reduction = 0.5

    x = jax.random.normal(k_x, (B, Cin, H, W), jnp.float32)
    params = init_transition_block(k_w, Cin, Cout)

    fwd = jax.jit(transition_block_forward)
    y = fwd(params, x)
    jax.block_until_ready(y)

    assert y.shape == (B, Cout, H // 2, W // 2) and y.dtype == jnp.float32
    y_ref = _reference(params, x)
    assert jnp.allclose(y, y_ref, atol=1e-3, rtol=1e-3), (
        float(jnp.max(jnp.abs(y - y_ref))))
    print("KERNEL_OK")
</pallas_src>

<mosaic_0001>
module attributes {stable_mosaic.version = 11 : i64} {
  func.func @_transition_kernel(%arg0: i32, %arg1: i32, %arg2: memref<1x48x256xf32, #tpu.memory_space<vmem>>, %arg3: memref<48x1xf32, #tpu.memory_space<vmem>>, %arg4: memref<48x1xf32, #tpu.memory_space<vmem>>, %arg5: memref<24x48xf32, #tpu.memory_space<vmem>>, %arg6: memref<256x64xf32, #tpu.memory_space<vmem>>, %arg7: memref<1x24x64xf32, #tpu.memory_space<vmem>>) attributes {dimension_semantics = [#tpu.dimension_semantics<parallel>, #tpu.dimension_semantics<parallel>], iteration_bounds = array<i64: 2, 1>, scalar_prefetch = 0 : i64, scratch_operands = 0 : i64, tpu.core_type = #tpu.core_type<tc>, window_params = [{transform_indices = @transform_0, window_bounds = array<i64: 1, 48, 256>}, {pipeline_mode = #tpu.pipeline_mode<synchronous>, transform_indices = @transform_1, window_bounds = array<i64: 48, 1>}, {pipeline_mode = #tpu.pipeline_mode<synchronous>, transform_indices = @transform_2, window_bounds = array<i64: 48, 1>}, {pipeline_mode = #tpu.pipeline_mode<synchronous>, transform_indices = @transform_3, window_bounds = array<i64: 24, 48>}, {pipeline_mode = #tpu.pipeline_mode<synchronous>, transform_indices = @transform_4, window_bounds = array<i64: 256, 64>}, {transform_indices = @transform_5, window_bounds = array<i64: 1, 24, 64>}]} {
    %c0 = arith.constant 0 : index
    %c0_0 = arith.constant 0 : index
    %c0_1 = arith.constant 0 : index
    %0 = vector.load %arg2[%c0, %c0_0, %c0_1] : memref<1x48x256xf32, #tpu.memory_space<vmem>>, vector<1x48x256xf32>
    %1 = vector.shape_cast %0 : vector<1x48x256xf32> to vector<48x256xf32>
    %c0_2 = arith.constant 0 : index
    %c0_3 = arith.constant 0 : index
    %2 = vector.load %arg3[%c0_2, %c0_3] : memref<48x1xf32, #tpu.memory_space<vmem>>, vector<48x1xf32>
    %3 = vector.broadcast %2 : vector<48x1xf32> to vector<48x256xf32>
    %4 = arith.mulf %1, %3 : vector<48x256xf32>
    %c0_4 = arith.constant 0 : index
    %c0_5 = arith.constant 0 : index
    %5 = vector.load %arg4[%c0_4, %c0_5] : memref<48x1xf32, #tpu.memory_space<vmem>>, vector<48x1xf32>
    %6 = vector.broadcast %5 : vector<48x1xf32> to vector<48x256xf32>
    %7 = arith.addf %4, %6 : vector<48x256xf32>
    %cst = arith.constant 0.000000e+00 : f32
    %8 = vector.broadcast %cst : f32 to vector<48x256xf32>
    %9 = arith.maximumf %7, %8 : vector<48x256xf32>
    %c0_6 = arith.constant 0 : index
    %c0_7 = arith.constant 0 : index
    %10 = vector.load %arg5[%c0_6, %c0_7] : memref<24x48xf32, #tpu.memory_space<vmem>>, vector<24x48xf32>
    %cst_8 = arith.constant dense<0.000000e+00> : vector<24x256xf32>
    %11 = tpu.matmul %10, %9, %cst_8 {dimension_numbers = #tpu.dot_dimension_numbers<[1], [0], [0], [1], [0, 0, 1, 1], [], []>} : vector<24x48xf32>, vector<48x256xf32>, vector<24x256xf32> -> vector<24x256xf32>
    %c0_9 = arith.constant 0 : index
    %c0_10 = arith.constant 0 : index
    %12 = vector.load %arg6[%c0_9, %c0_10] : memref<256x64xf32, #tpu.memory_space<vmem>>, vector<256x64xf32>
    %cst_11 = arith.constant dense<0.000000e+00> : vector<24x64xf32>
    %13 = tpu.matmul %11, %12, %cst_11 {dimension_numbers = #tpu.dot_dimension_numbers<[1], [0], [0], [1], [0, 0, 1, 1], [], []>} : vector<24x256xf32>, vector<256x64xf32>, vector<24x64xf32> -> vector<24x64xf32>
    %c0_12 = arith.constant 0 : index
    %c0_13 = arith.constant 0 : index
    %c0_14 = arith.constant 0 : index
    %14 = vector.load %arg7[%c0_12, %c0_13, %c0_14] : memref<1x24x64xf32, #tpu.memory_space<vmem>>, vector<1x24x64xf32>
    %15 = vector.shape_cast %14 : vector<1x24x64xf32> to vector<24x64xf32>
    %16 = vector.shape_cast %13 : vector<24x64xf32> to vector<1x24x64xf32>
    tpu.vector_store %arg7[%c0_12, %c0_13, %c0_14], %16 {strides = array<i32>} : memref<1x24x64xf32, #tpu.memory_space<vmem>>, vector<1x24x64xf32>,
    return
  }
  func.func @transform_0(%arg0: i32, %arg1: i32) -> (i32, i32, i32) {
    %c0_i32 = arith.constant 0 : i32
    %c0_i32_0 = arith.constant 0 : i32
    return %arg0, %c0_i32, %arg1 : i32, i32, i32
  }
  func.func @transform_1(%arg0: i32, %arg1: i32) -> (i32, i32) {
    %c0_i32 = arith.constant 0 : i32
    %c0_i32_0 = arith.constant 0 : i32
    %c0_i32_1 = arith.constant 0 : i32
    return %c0_i32, %c0_i32_0 : i32, i32
  }
  func.func @transform_2(%arg0: i32, %arg1: i32) -> (i32, i32) {
    %c0_i32 = arith.constant 0 : i32
    %c0_i32_0 = arith.constant 0 : i32
    %c0_i32_1 = arith.constant 0 : i32
    return %c0_i32, %c0_i32_0 : i32, i32
  }
  func.func @transform_3(%arg0: i32, %arg1: i32) -> (i32, i32) {
    %c0_i32 = arith.constant 0 : i32
    %c0_i32_0 = arith.constant 0 : i32
    %c0_i32_1 = arith.constant 0 : i32
    return %c0_i32, %c0_i32_0 : i32, i32
  }
  func.func @transform_4(%arg0: i32, %arg1: i32) -> (i32, i32) {
    %c0_i32 = arith.constant 0 : i32
    %c0_i32_0 = arith.constant 0 : i32
    %c0_i32_1 = arith.constant 0 : i32
    return %c0_i32, %c0_i32_0 : i32, i32
  }
  func.func @transform_5(%arg0: i32, %arg1: i32) -> (i32, i32, i32) {
    %c0_i32 = arith.constant 0 : i32
    %c0_i32_0 = arith.constant 0 : i32
    return %arg0, %c0_i32, %arg1 : i32, i32, i32
  }
}

</mosaic_0001>

<bundles_post_ra>
// kernel: transition_block_forward.1
= control target key start
LH: loop header
LB: loop body
LE: loop exit
PB: predicated region body
PF: predicated region fallthrough
CT: control target
= control target key end

     0   :  { %s859_s18 = smov 0   ;;  %s861_s19 = smov 0   ;;  %s1058_s0 = inlined_call_operand.vmem [shape: f32[2,48,256], index: 0, kind: input, shape index: {}]   ;;  %s1059_s1 = inlined_call_operand.vmem [shape: f32[48,1], index: 1, kind: input, shape index: {}]   ;;  %s1060_s2 = inlined_call_operand.vmem [shape: f32[48,1], index: 2, kind: input, shape index: {}]   ;;  %s1061_s3 = inlined_call_operand.vmem [shape: f32[24,48], index: 3, kind: input, shape index: {}]   ;;  %s1062_s4 = inlined_call_operand.vmem [shape: f32[256,64], index: 4, kind: input, shape index: {}]   ;;  %s1063_s5 = inlined_call_operand.vmem [shape: f32[2,24,64], index: 5, kind: output, shape index: {}]  }
   0x1   :  { %s863_s20 = smov 0  }
   0x2 LB: > { %s27_s21 = sadd.s32 1, %s821_s19  ;;  %p680_p0 = scmp.ge.s32.totalorder %s825_s20, 1  ;;  %s825_s20 = sphi %s863_s20, %s15_s20   ;;  %s821_s19 = sphi %s861_s19, %s1065_s19   ;;  %s817_s18 = sphi %s859_s18, %s1064_s18  }
   0x3   : > { %p29_p1 = scmp.ge.s32.totalorder %s27_s21, 2  ;;  %p208_p2 = scmp.lt.s32.totalorder %s825_s20, 3 }
   0x5   : > { %s1067_s21 = smov (%p29_p1, %s27_s21), 0  ;;  %p209_p3 = pnand %p680_p0, %p208_p2 }
   0x6   : > { %v321_v0 = vld [vmem:[%s1060_s2] sm:$0xff] (!%p209_p3)  ;;  %v827_v2 = vmov (!%p209_p3), 0   ;;  %v322_v3 = vld [vmem:[%s1060_s2 + $0x8] sm:$0xff] (!%p209_p3)  ;;  %v276_v5 = vld [vmem:[%s1059_s1 + $0x18] sm:$0xff] (!%p209_p3)  ;;  %v828_v13 = vmov (!%p209_p3), 0.0   ;;  %p244_p4 = scmp.lt.s32.totalorder (!%p209_p3), %s817_s18, 1 }
   0x7   : > { %212 = sbr.rel (%p209_p3) target bundleno = 604 (0x25c), region = 40  ;;  %v273_v1 = vld [vmem:[%s1059_s1] sm:$0xff] (!%p209_p3)  ;;  %802 = vset.pattern.permute.xlu1 (!%p209_p3), %v827_v2  ;;  %801 = vset.pattern.permute.xlu0 (!%p209_p3), %v827_v2  ;;  %v274_v4 = vld [vmem:[%s1059_s1 + $0x8] sm:$0xff] (!%p209_p3)  ;;  %v275_v6 = vld [vmem:[%s1059_s1 + $0x10] sm:$0xff] (!%p209_p3)  ;;  %vm384_vm0 = vcmask (!%p209_p3), 392192   ;;  %vm589_vm1 = vcmask (!%p209_p3), 523264  }
   0x8   : > { %329 = vperm.xlu1 (!%p209_p3), %802, %v321_v0   ;;  %281 = vperm.xlu0 (!%p209_p3), %801, %v273_v1   ;;  %v324_v7 = vld [vmem:[%s1060_s2 + $0x18] sm:$0xff] (!%p209_p3)  ;;  %v323_v8 = vld [vmem:[%s1060_s2 + $0x10] sm:$0xff] (!%p209_p3)  ;;  %v278_v9 = vld [vmem:[%s1059_s1 + $0x28] sm:$0xff] (!%p209_p3) }
   0x9   : > { %v277_v10 = vld [vmem:[%s1059_s1 + $0x20] sm:$0xff] (!%p209_p3)  ;;  %v326_v11 = vld [vmem:[%s1060_s2 + $0x28] sm:$0xff] (!%p209_p3)  ;;  %458 = vmatprep.mubr.f32.mxu0 (!%p209_p3), %v828_v13  ;;  %v495_v19 = vld [vmem:[%s1062_s4 + $0x90] sm:$0xff] (!%p209_p3) }
   0xa   : > { %v325_v12 = vld [vmem:[%s1060_s2 + $0x20] sm:$0xff] (!%p209_p3)  ;;  %v494_v15 = vld [vmem:[%s1062_s4 + $0x88] sm:$0xff] (!%p209_p3)  ;;  %v496_v20 = vld [vmem:[%s1062_s4 + $0x98] sm:$0xff] (!%p209_p3) }
   0xb   : > { %v493_v14 = vld [vmem:[%s1062_s4 + $0x80] sm:$0xff] (!%p209_p3)  ;;  %v478_v18 = vld [vmem:[%s1062_s4 + $0x8] sm:$0xff] (!%p209_p3)  ;;  %v745_v22 = vpack.c.bf16 (!%p209_p3), %v496_v20, %v495_v19  ;;  %v479_v23 = vld [vmem:[%s1062_s4 + $0x10] sm:$0xff] (!%p209_p3) }
   0xc   : > { %334 = vperm.xlu1 (!%p209_p3), %802, %v322_v3   ;;  %286 = vperm.xlu0 (!%p209_p3), %801, %v274_v4   ;;  %v477_v16 = vld [vmem:[%s1062_s4] sm:$0xff] (!%p209_p3)  ;;  %v741_v17 = vpack.c.bf16 (!%p209_p3), %v494_v15, %v493_v14  ;;  %v480_v24 = vld [vmem:[%s1062_s4 + $0x18] sm:$0xff] (!%p209_p3)  ;;  %v498_v26 = vld [vmem:[%s1062_s4 + $0xa8] sm:$0xff] (!%p209_p3) }
   0xd   : > { %v743_v21 = vpack.c.bf16 (!%p209_p3), %v478_v18, %v477_v16  ;;  %v497_v25 = vld [vmem:[%s1062_s4 + $0xa0] sm:$0xff] (!%p209_p3)  ;;  %v747_v27 = vpack.c.bf16 (!%p209_p3), %v480_v24, %v479_v23  ;;  %v482_v30 = vld [vmem:[%s1062_s4 + $0x28] sm:$0xff] (!%p209_p3)  ;;  %v499_v31 = vld [vmem:[%s1062_s4 + $0xb0] sm:$0xff] (!%p209_p3) }
   0xe   : > { %742 = vmatprep.subr.bf16.mxu1 %v741_v17  ;;  %v749_v28 = vpack.c.bf16 %v498_v26, %v497_v25  ;;  %v481_v29 = vld [vmem:[%s1062_s4 + $0x20] sm:$0xff]  ;;  %v500_v32 = vld [vmem:[%s1062_s4 + $0xb8] sm:$0xff]  ;;  %v483_v35 = vld [vmem:[%s1062_s4 + $0x30] sm:$0xff]  ;;  %s1069_s18 = smov (!%p244_p4, %s817_s18), 1 }
   0xf   : > { %744 = vmatpush3.bf16.msra.mxu1 %v743_v21  ;;  %v751_v33 = vpack.c.bf16 %v482_v30, %v481_v29  ;;  %v753_v34 = vpack.c.bf16 %v500_v32, %v499_v31  ;;  %v484_v36 = vld [vmem:[%s1062_s4 + $0x38] sm:$0xff]  ;;  %v501_v37 = vld [vmem:[%s1062_s4 + $0xc0] sm:$0xff]  ;;  %v502_v38 = vld [vmem:[%s1062_s4 + $0xc8] sm:$0xff]  ;;  %s773_s22 = smul.u32 96, %s1069_s18 }
  0x10   : > { %296 = vperm.xlu1 %802, %v276_v5   ;;  %291 = vperm.xlu0 %801, %v275_v6   ;;  %v755_v39 = vpack.c.bf16 %v484_v36, %v483_v35  ;;  %v757_v40 = vpack.c.bf16 %v502_v38, %v501_v37  ;;  %v485_v41 = vld [vmem:[%s1062_s4 + $0x40] sm:$0xff]  ;;  %v486_v42 = vld [vmem:[%s1062_s4 + $0x48] sm:$0xff]  ;;  %v503_v43 = vld [vmem:[%s1062_s4 + $0xd0] sm:$0xff]  ;;  %s774_s11 = smul.u32 24, %s1069_s18 }
  0x11   : > { %746 = vmatprep.subr.bf16.mxu1 %v745_v22  ;;  %v504_v44 = vld [vmem:[%s1062_s4 + $0xd8] sm:$0xff]  ;;  %v759_v45 = vpack.c.bf16 %v486_v42, %v485_v41  ;;  %v487_v47 = vld [vmem:[%s1062_s4 + $0x50] sm:$0xff]  ;;  %v505_v49 = vld [vmem:[%s1062_s4 + $0xe0] sm:$0xff]  ;;  %s1014_s25 = scalar_lea.vmem %s1058_s0, %s773_s22 }
  0x12   : > { %v761_v46 = vpack.c.bf16 %v504_v44, %v503_v43  ;;  %v488_v48 = vld [vmem:[%s1062_s4 + $0x58] sm:$0xff]  ;;  %v506_v50 = vld [vmem:[%s1062_s4 + $0xe8] sm:$0xff]  ;;  %v489_v53 = vld [vmem:[%s1062_s4 + $0x60] sm:$0xff]  ;;  %s260_s14 = scalar_lea.vmem %s1063_s5, %s774_s11 }
  0x13   : > { %748 = vmatpush3.bf16.msra.mxu1 %v747_v27  ;;  %v763_v51 = vpack.c.bf16 %v488_v48, %v487_v47  ;;  %v765_v52 = vpack.c.bf16 %v506_v50, %v505_v49  ;;  %v490_v54 = vld [vmem:[%s1062_s4 + $0x68] sm:$0xff]  ;;  %v507_v55 = vld [vmem:[%s1062_s4 + $0xf0] sm:$0xff]  ;;  %v508_v56 = vld [vmem:[%s1062_s4 + $0xf8] sm:$0xff] }
  0x14   : > { %344 = vperm.xlu1 %802, %v324_v7   ;;  %339 = vperm.xlu0 %801, %v323_v8   ;;  %v767_v57 = vpack.c.bf16 %v490_v54, %v489_v53  ;;  %v769_v58 = vpack.c.bf16 %v508_v56, %v507_v55  ;;  %v261_v59 = vld [vmem:[%s1014_s25] sm:$0xff]  ;;  %v262_v60 = vld [vmem:[%s1014_s25 + $0x8] sm:$0xff]  ;;  %v263_v1 = vld [vmem:[%s1014_s25 + $0x10] sm:$0xff] }
  0x15   : > { %750 = vmatprep.subr.bf16.mxu1 %v749_v28  ;;  %v264_v2 = vld [vmem:[%s1014_s25 + $0x18] sm:$0xff]  ;;  %v265_v16 = vld [vmem:[%s1014_s25 + $0x20] sm:$0xff]  ;;  %v266_v17 = vld [vmem:[%s1014_s25 + $0x28] sm:$0xff] }
  0x16   : > { %v268_v14 = vld [vmem:[%s1014_s25 + $0x38] sm:$0xff]  ;;  %v271_v38 = vld [vmem:[%s1014_s25 + $0x50] sm:$0xff]  ;;  %v269_v42 = vld [vmem:[%s1014_s25 + $0x40] sm:$0xff] }
  0x17   : > { %752 = vmatpush3.bf16.msra.mxu1 %v751_v33  ;;  %v270_v43 = vld [vmem:[%s1014_s25 + $0x48] sm:$0xff] }
  0x18   : > { %306 = vperm.xlu1 %802, %v278_v9   ;;  %301 = vperm.xlu0 %801, %v277_v10   ;;  %v267_v10 = vld [vmem:[%s1014_s25 + $0x30] sm:$0xff] }
  0x19   : > { %754 = vmatprep.subr.bf16.mxu1 %v753_v34 }
  0x1b   : > { %756 = vmatpush3.bf16.msra.mxu1 %v755_v39 }
  0x1c   : > { %354 = vperm.xlu1 %802, %v326_v11   ;;  %349 = vperm.xlu0 %801, %v325_v12  }
  0x1d   : > { %758 = vmatprep.subr.bf16.mxu1 %v757_v40  ;;  %v272_v40 = vld [vmem:[%s1014_s25 + $0x58] sm:$0xff] }
  0x1f   : > { %760 = vmatpush3.bf16.msra.mxu1 %v759_v45 }
  0x20   : > { %762 = vmatprep.subr.bf16.mxu1 %v761_v46 }
  0x23   : > { %764 = vmatpush3.bf16.msra.mxu1 %v763_v51 }
  0x24   : > { %766 = vmatprep.subr.bf16.mxu1 %v765_v52 }
  0x27   : > { %768 = vmatpush3.bf16.msra.mxu1 %v767_v57 }
  0x28   : > { %770 = vmatprep.subr.bf16.mxu1 %v769_v58 }
  0x87   : > { %v330_v61 = vpop.permute.xlu1 %329  ;;  %v282_v62 = vpop.permute.xlu0 %281 }
  0x88   : > { %v309_v63 = vmul.f32 %v282_v62, %v261_v59  ;;  %v310_v0 = vmul.f32 %v282_v62, %v262_v60  ;;  %v381_v62 = vld [vmem:[%s1061_s3] sm:$0xff] }
  0x8a   : > { %v357_v7 = vadd.f32 %v330_v61, %v309_v63  ;;  %v358_v8 = vadd.f32 %v330_v61, %v310_v0  ;;  %v382_v63 = vld [vmem:[%s1061_s3 + $0x8] sm:$0xff]  ;;  %v383_v0 = vld [vmem:[%s1061_s3 + $0x10] sm:$0xff] }
  0x8b   : > { %v335_v3 = vpop.permute.xlu1 %334  ;;  %v287_v4 = vpop.permute.xlu0 %286 }
  0x8c   : > { %v311_v5 = vmul.f32 %v287_v4, %v263_v1  ;;  %v312_v6 = vmul.f32 %v287_v4, %v264_v2  ;;  %v370_v18 = vmax.f32 %v358_v8, 0.0  ;;  %v369_v20 = vmax.f32 %v357_v7, 0.0  ;;  %v491_v1 = vld [vmem:[%s1062_s4 + $0x70] sm:$0xff]  ;;  %v492_v2 = vld [vmem:[%s1062_s4 + $0x78] sm:$0xff] }
  0x8e   : > { %v359_v9 = vadd.f32 %v335_v3, %v311_v5  ;;  %v360_v11 = vadd.f32 %v335_v3, %v312_v6  ;;  %v771_v3 = vpack.c.bf16 %v492_v2, %v491_v1 }
  0x8f   : > { %v297_v12 = vpop.permute.xlu1 %296  ;;  %v292_v15 = vpop.permute.xlu0 %291 }
  0x90   : > { %v372_v19 = vmax.f32 %v360_v11, 0.0  ;;  %v371_v21 = vmax.f32 %v359_v9, 0.0  ;;  %v315_v22 = vmul.f32 %v297_v12, %v267_v10  ;;  %v316_v23 = vmul.f32 %v297_v12, %v268_v14  ;;  %772 = vmatpush3.bf16.msra.mxu1 %v771_v3 }
  0x91   : > { %v313_v24 = vmul.f32 %v292_v15, %v265_v16  ;;  %v314_v25 = vmul.f32 %v292_v15, %v266_v17 }
  0x92   : > { %v729_v28 = vpack.c.bf16 %v372_v19, %v370_v18  ;;  %v731_v29 = vpack.c.bf16 %v371_v21, %v369_v20 }
  0x93   : > { %v345_v26 = vpop.permute.xlu1 %344  ;;  %v340_v27 = vpop.permute.xlu0 %339 }
  0x94   : > { %v363_v30 = vadd.f32 %v345_v26, %v315_v22  ;;  %v364_v31 = vadd.f32 %v345_v26, %v316_v23  ;;  %v361_v32 = vadd.f32 %v340_v27, %v313_v24  ;;  %v362_v33 = vadd.f32 %v340_v27, %v314_v25  ;;  %730 = vmatprep.subr.bf16.mxu0 %v729_v28 }
  0x95   : > { %732 = vmatpush1.bf16.msra.mxu0 %v731_v29 }
  0x96   : > { %v375_v34 = vmax.f32 %v363_v30, 0.0  ;;  %v376_v35 = vmax.f32 %v364_v31, 0.0  ;;  %v373_v36 = vmax.f32 %v361_v32, 0.0  ;;  %v374_v37 = vmax.f32 %v362_v33, 0.0 }
  0x97   : > { %v307_v39 = vpop.permute.xlu1 %306  ;;  %v302_v41 = vpop.permute.xlu0 %301 }
  0x98   : > { %v733_v44 = vpack.c.bf16 %v376_v35, %v374_v37  ;;  %v735_v45 = vpack.c.bf16 %v375_v34, %v373_v36  ;;  %v319_v46 = vmul.f32 %v307_v39, %v271_v38  ;;  %v320_v47 = vmul.f32 %v307_v39, %v272_v40 }
  0x99   : > { %v317_v48 = vmul.f32 %v302_v41, %v269_v42  ;;  %v318_v49 = vmul.f32 %v302_v41, %v270_v43 }
  0x9a   : > { %734 = vmatprep.subr.bf16.mxu0 %v733_v44 }
  0x9b   : > { %v355_v50 = vpop.permute.xlu1 %354  ;;  %v350_v51 = vpop.permute.xlu0 %349  ;;  %736 = vmatpush1.bf16.msra.mxu0 %v735_v45 }
  0x9c   : > { %v367_v52 = vadd.f32 %v355_v50, %v319_v46  ;;  %v368_v53 = vadd.f32 %v355_v50, %v320_v47  ;;  %v365_v54 = vadd.f32 %v350_v51, %v317_v48  ;;  %v366_v55 = vadd.f32 %v350_v51, %v318_v49 }
  0x9e   : > { %v379_v56 = vmax.f32 %v367_v52, 0.0  ;;  %v380_v57 = vmax.f32 %v368_v53, 0.0  ;;  %v377_v58 = vmax.f32 %v365_v54, 0.0  ;;  %v378_v59 = vmax.f32 %v366_v55, 0.0 }
  0xa0   : > { %v737_v60 = vpack.c.bf16 %v380_v57, %v378_v59  ;;  %v739_v61 = vpack.c.bf16 %v379_v56, %v377_v58 }
  0xa2   : > { %738 = vmatprep.subr.bf16.mxu0 %v737_v60 }
  0xa3   : > { %740 = vmatpush1.bf16.msra.mxu0 %v739_v61 }
  0xa6   : > { %683 = vmatmul.mubr.msk.f32.vlgmr.msra.gmra.mrb[0].mxu0 %vm384_vm0, %v381_v62 }
  0xa7   : > { %464 = vmatprep.mubr.f32.mxu0 %v828_v13 }
  0xaa   : > { %684 = vmatmul.mubr.msk.f32.gmra.mrb[2].mxu0 %vm384_vm0, %v382_v63 }
  0xab   : > { %470 = vmatprep.mubr.f32.mxu0 %v828_v13 }
  0xae   : > { %685 = vmatmul.mubr.msk.f32.gmra.mrb[4].mxu0 %vm384_vm0, %v383_v0 }
 0x179   : > { %v460_v4 = vpop.f32.mrb[0].mxu0 }
 0x17a   : > { %v462_v5 = vpop.f32.mrb[1].mxu0 }
 0x17b   : > { %573 = vmatprep.mubr.f32.mxu1 %v462_v5 }
 0x17c   : > { %574 = vmatmul.mubr.f32.vlgmr.msra.gmra.mrb[0].mxu1 %v460_v4 }
 0x17d   : > { %v466_v13 = vpop.f32.mrb[2].mxu0 }
 0x17e   : > { %v468_v6 = vpop.f32.mrb[3].mxu0 }
 0x17f   : > { %578 = vmatprep.mubr.f32.mxu1 %v468_v6 }
 0x180   : > { %579 = vmatmul.mubr.f32.gmra.mrb[2].mxu1 %v466_v13 }
 0x181   : > { %v472_v7 = vpop.f32.mrb[4].mxu0 }
 0x182   : > { %v474_v8 = vpop.f32.mrb[5].mxu0 }
 0x183   : > { %583 = vmatprep.mubr.f32.mxu1 %v474_v8 }
 0x184   : > { %584 = vmatmul.mubr.f32.gmra.mrb[4].mxu1 %v472_v7 }
 0x24f   : > { %v720_v9 = vpop.f32.mrb[0].mxu1 }
 0x250   : > { %v721_v10 = vpop.f32.mrb[1].mxu1 }
 0x251   : > { %v722_v11 = vadd.f32 %v721_v10, %v720_v9 }
 0x253   : > { %590 = vst.msk [vmem:[%s260_s14] sm:$0xff] %vm589_vm1, %v722_v11  ;;  %v723_v12 = vpop.f32.mrb[2].mxu1 }
 0x254   : > { %v724_v14 = vpop.f32.mrb[3].mxu1 }
 0x255   : > { %v725_v15 = vadd.f32 %v724_v14, %v723_v12 }
 0x257   : > { %591 = vst.msk [vmem:[%s260_s14 + $0x8] sm:$0xff] %vm589_vm1, %v725_v15  ;;  %v726_v16 = vpop.f32.mrb[4].mxu1 }
 0x258   : > { %v727_v17 = vpop.f32.mrb[5].mxu1 }
 0x259   : > { %v728_v18 = vadd.f32 %v727_v17, %v726_v16 }
 0x25b   : > { %592 = vst.msk [vmem:[%s260_s14 + $0x10] sm:$0xff] %vm589_vm1, %v728_v18 }
 0x25c PF: > { %s15_s20 = sadd.s32 1, %s825_s20   ;;  %s1064_s18 = smov %s821_s19 }
 0x25d   : > { %p12_p5 = scmp.ge.s32.totalorder %s15_s20, 4   ;;  %s1065_s19 = smov %s1067_s21 }
 0x25f   :  { %14 = sbr.rel (!%p12_p5) target bundleno = 2 (0x2), region = 70 }

</bundles_post_ra>
